<compile_context>
chip_gen: v7x
topology: tpu7x:2x2x1
jax: 0.10.0
libtpu: 0.0.40
codegen_flags: <defaults>
</compile_context>

<pallas_src>
import functools

import jax
import jax.numpy as jnp
from jax import lax
from jax.experimental import pallas as pl
from jax.experimental.pallas import tpu as pltpu


_CHUNK = 512      # batch elements (lanes) per inner-loop step; multiple of 128
_SMALL_B = 512    # at or below this batch, take the grid-less single launch


def _round_up(n, m):
    return (n + m - 1) // m * m


def _cdiv(a, b):
    return -(-a // b)


def _mlp_small_kernel(x_ref, w1t_ref, b1_ref, w2t_ref, b2_ref, o_ref):
    """Grid-less path for small batches (latency-bound regime).

    x_ref  : [B, D]   input, native row-major layout (full block)
    w1t_ref: [D, H]   linear1 weight, pre-transposed
    b1_ref : [1, H]   linear1 bias row (broadcasts over batch sublanes)
    w2t_ref: [H, 1]   linear2 weight column
    b2_ref : [1]      linear2 bias, scalar in SMEM
    o_ref  : [B, 1]   output
    """
    x = x_ref[...]
    h = jnp.dot(x, w1t_ref[...], preferred_element_type=jnp.float32)   # MXU
    h = jnp.maximum(h + b1_ref[...], 0.0)
    out = jnp.dot(h, w2t_ref[...], preferred_element_type=jnp.float32)  # MXU
    o_ref[...] = (out + b2_ref[0]).astype(o_ref.dtype)


def _mlp_grid_kernel(x_ref, w1_ref, b1_ref, w2_ref, b2_ref, o_ref):
    """Batch-tiled path; batch is lane-major so stores are unmasked/lane-dense.

    x_ref : [ncb, D, C]  ncb lane-chunks of C batch elements each
    w1_ref: [H, D]       linear1 weight (torch layout), VMEM-resident
    b1_ref: [H, 1]       linear1 bias column (broadcasts over lanes)
    w2_ref: [1, H]       linear2 weight row, VMEM-resident
    b2_ref: [1]          linear2 bias, scalar in SMEM
    o_ref : [ncb, 1, C]  output chunks
    """
    w1 = w1_ref[...]
    b1 = b1_ref[...]
    w2 = w2_ref[...]
    b2 = b2_ref[0]
    ncb = x_ref.shape[0]

    def chunk(c, carry):
        xc = x_ref[c]                                                   # [D, C]
        h = jnp.dot(w1, xc, preferred_element_type=jnp.float32) + b1    # MXU
        h = jnp.maximum(h, 0.0)
        out = jnp.dot(w2, h, preferred_element_type=jnp.float32) + b2   # MXU
        o_ref[c] = out.astype(o_ref.dtype)
        return carry

    if ncb == 1:
        chunk(0, 0)
    else:
        # fori_loop (not a Python for) bounds the live range to one chunk:
        # h is [H, C] (~16 vregs at C=512), so big DMA blocks never spill.
        lax.fori_loop(0, ncb, chunk, 0, unroll=2)


@functools.partial(jax.jit, static_argnames=("block_b",))
def mlp_forward(x, w1, b1, w2, b2, block_b=32768):
    """x: [B, D]; w1: [H, D]; b1: [H]; w2: [1, H]; b2: [1] -> [B, 1]."""
    B, D = x.shape
    H = w1.shape[0]
    vmem = pltpu.MemorySpace.VMEM
    smem = pltpu.MemorySpace.SMEM
    b2_s = b2.reshape(1)

    flops = 2 * B * (D * H + H)
    bytes_accessed = (B * D + B + H * D + 3 * H + 1) * 4
    cost = pl.CostEstimate(flops=flops, transcendentals=0,
                           bytes_accessed=bytes_accessed)

    if B <= _SMALL_B:
        # Single launch: x consumed as-is, output emitted directly as [B, 1];
        # no host-side transpose/pad of x and no trailing slice/reshape.
        return pl.pallas_call(
            _mlp_small_kernel,
            out_shape=jax.ShapeDtypeStruct((B, 1), x.dtype),
            in_specs=[
                pl.BlockSpec(memory_space=vmem),   # x
                pl.BlockSpec(memory_space=vmem),   # w1^T
                pl.BlockSpec(memory_space=vmem),   # b1 row
                pl.BlockSpec(memory_space=vmem),   # w2 column
                pl.BlockSpec(memory_space=smem),   # b2 scalar
            ],
            out_specs=pl.BlockSpec(memory_space=vmem),
            cost_estimate=cost,
        )(x, w1.T, b1.reshape(1, H), w2.reshape(H, 1), b2_s)

    # ------------------------- batch-tiled grid path -------------------------
    block_b = max(_CHUNK, _round_up(block_b, _CHUNK))
    # Force >= 2 grid steps so ("parallel",) semantics can split the batch
    # across both v7x TensorCores; pick the block size so padding < one chunk.
    n_blocks = max(2, _cdiv(B, block_b))
    bt = _round_up(_cdiv(B, n_blocks), _CHUNK)      # batch elements per step
    ncb = bt // _CHUNK                              # lane-chunks per step
    b_pad = n_blocks * bt
    n_chunks = n_blocks * ncb

    # Single pass over x: pad + regroup into [n_chunks, D, CHUNK] so the batch
    # rides the 128-lane axis inside the kernel and the inner loop only indexes
    # the leading axis. (The transpose is unavoidable given the [B, D] input.)
    x_pad = jnp.pad(x, ((0, b_pad - B), (0, 0)))
    xr = x_pad.reshape(n_chunks, _CHUNK, D).transpose(0, 2, 1)   # [nc, D, C]

    outr = pl.pallas_call(
        _mlp_grid_kernel,
        out_shape=jax.ShapeDtypeStruct((n_chunks, 1, _CHUNK), x.dtype),
        grid=(n_blocks,),
        in_specs=[
            pl.BlockSpec((ncb, D, _CHUNK), lambda i: (i, 0, 0)),   # x block
            pl.BlockSpec((H, D), lambda i: (0, 0)),                # w1 resident
            pl.BlockSpec((H, 1), lambda i: (0, 0)),                # b1 resident
            pl.BlockSpec((1, H), lambda i: (0, 0)),                # w2 resident
            pl.BlockSpec(memory_space=smem),                       # b2 scalar
        ],
        out_specs=pl.BlockSpec((ncb, 1, _CHUNK), lambda i: (i, 0, 0)),
        compiler_params=pltpu.CompilerParams(
            dimension_semantics=("parallel",)),                    # megacore
        cost_estimate=cost,
    )(xr, w1, b1.reshape(H, 1), w2, b2_s)

    return outr.reshape(-1)[:B].reshape(B, 1)


def init_params(key, input_dim, Nd=100):
    """nn.Linear-style init (uniform +/- 1/sqrt(fan_in)), torch weight layout."""
    hidden_dim = Nd // input_dim
    k1, k2, k3, k4 = jax.random.split(key, 4)
    lim1 = 1.0 / float(input_dim) ** 0.5
    lim2 = 1.0 / float(hidden_dim) ** 0.5
    w1 = jax.random.uniform(k1, (hidden_dim, input_dim), jnp.float32, -lim1, lim1)
    b1 = jax.random.uniform(k2, (hidden_dim,), jnp.float32, -lim1, lim1)
    w2 = jax.random.uniform(k3, (1, hidden_dim), jnp.float32, -lim2, lim2)
    b2 = jax.random.uniform(k4, (1,), jnp.float32, -lim2, lim2)
    return w1, b1, w2, b2


if __name__ == "__main__":
    input_dim = 4            # hidden_dim = 100 // 4 = 25
    key = jax.random.PRNGKey(0)
    kx1, kx2, kx3, kp = jax.random.split(key, 4)
    w1, b1, w2, b2 = init_params(kp, input_dim, Nd=100)

    def ref_fn(xv):
        h = jnp.maximum(
            jnp.dot(xv, w1.T, precision=lax.Precision.HIGHEST) + b1, 0.0)
        return jnp.dot(h, w2.T, precision=lax.Precision.HIGHEST) + b2

    # 1) Small batch -> grid-less single-launch path.
    x_s = jax.random.normal(kx1, (8, input_dim), jnp.float32)
    out_s = jax.block_until_ready(mlp_forward(x_s, w1, b1, w2, b2))
    assert out_s.shape == (8, 1)
    assert jnp.allclose(out_s, ref_fn(x_s), atol=1e-3, rtol=1e-3)

    # 2) Forced-small blocks -> multi-step grid path with batch padding.
    x_m = jax.random.normal(kx2, (1000, input_dim), jnp.float32)
    out_m = jax.block_until_ready(mlp_forward(x_m, w1, b1, w2, b2, block_b=512))
    assert out_m.shape == (1000, 1)
    assert jnp.allclose(out_m, ref_fn(x_m), atol=1e-3, rtol=1e-3)

    # 3) Default blocks -> 2 grid steps (v7x megacore) + in-kernel chunk loop.
    x_l = jax.random.normal(kx3, (4096, input_dim), jnp.float32)
    out_l = jax.block_until_ready(mlp_forward(x_l, w1, b1, w2, b2))
    assert out_l.shape == (4096, 1)
    assert jnp.allclose(out_l, ref_fn(x_l), atol=1e-3, rtol=1e-3)

    print("KERNEL_OK")
</pallas_src>

<mosaic_0001>
module attributes {stable_mosaic.version = 11 : i64} {
  func.func @_mlp_small_kernel(%arg0: memref<8x4xf32, #tpu.memory_space<vmem>>, %arg1: memref<4x25xf32, #tpu.memory_space<vmem>>, %arg2: memref<1x25xf32, #tpu.memory_space<vmem>>, %arg3: memref<25x1xf32, #tpu.memory_space<vmem>>, %arg4: memref<1xf32, #tpu.memory_space<smem>>, %arg5: memref<8x1xf32, #tpu.memory_space<vmem>>) attributes {dimension_semantics = [], scalar_prefetch = 0 : i64, scratch_operands = 0 : i64, tpu.core_type = #tpu.core_type<tc>} {
    %c0 = arith.constant 0 : index
    %c0_0 = arith.constant 0 : index
    %0 = vector.load %arg0[%c0, %c0_0] : memref<8x4xf32, #tpu.memory_space<vmem>>, vector<8x4xf32>
    %c0_1 = arith.constant 0 : index
    %c0_2 = arith.constant 0 : index
    %1 = vector.load %arg1[%c0_1, %c0_2] : memref<4x25xf32, #tpu.memory_space<vmem>>, vector<4x25xf32>
    %cst = arith.constant dense<0.000000e+00> : vector<8x25xf32>
    %2 = tpu.matmul %0, %1, %cst {dimension_numbers = #tpu.dot_dimension_numbers<[1], [0], [0], [1], [0, 0, 1, 1], [], []>} : vector<8x4xf32>, vector<4x25xf32>, vector<8x25xf32> -> vector<8x25xf32>
    %c0_3 = arith.constant 0 : index
    %c0_4 = arith.constant 0 : index
    %3 = vector.load %arg2[%c0_3, %c0_4] : memref<1x25xf32, #tpu.memory_space<vmem>>, vector<1x25xf32>
    %4 = vector.broadcast %3 : vector<1x25xf32> to vector<8x25xf32>
    %5 = arith.addf %2, %4 : vector<8x25xf32>
    %cst_5 = arith.constant 0.000000e+00 : f32
    %6 = vector.broadcast %cst_5 : f32 to vector<8x25xf32>
    %7 = arith.maximumf %5, %6 : vector<8x25xf32>
    %c0_6 = arith.constant 0 : index
    %c0_7 = arith.constant 0 : index
    %8 = vector.load %arg3[%c0_6, %c0_7] : memref<25x1xf32, #tpu.memory_space<vmem>>, vector<25x1xf32>
    %cst_8 = arith.constant dense<0.000000e+00> : vector<8x1xf32>
    %9 = tpu.matmul %7, %8, %cst_8 {dimension_numbers = #tpu.dot_dimension_numbers<[1], [0], [0], [1], [0, 0, 1, 1], [], []>} : vector<8x25xf32>, vector<25x1xf32>, vector<8x1xf32> -> vector<8x1xf32>
    %c0_9 = arith.constant 0 : index
    %10 = memref.load %arg4[%c0_9] : memref<1xf32, #tpu.memory_space<smem>>
    %11 = vector.broadcast %10 : f32 to vector<8x1xf32>
    %12 = arith.addf %9, %11 : vector<8x1xf32>
    %c0_10 = arith.constant 0 : index
    %c0_11 = arith.constant 0 : index
    %13 = vector.load %arg5[%c0_10, %c0_11] : memref<8x1xf32, #tpu.memory_space<vmem>>, vector<8x1xf32>
    tpu.vector_store %arg5[%c0_10, %c0_11], %12 {strides = array<i32>} : memref<8x1xf32, #tpu.memory_space<vmem>>, vector<8x1xf32>,
    return
  }
}

</mosaic_0001>

<bundles_post_ra>
// kernel: mlp_forward.1
= control target key start
LH: loop header
LB: loop body
LE: loop exit
PB: predicated region body
PF: predicated region fallthrough
CT: control target
= control target key end

     0   :  { %vm34_vm0 = vcmask 1043456   ;;  %vm30_vm1 = vcmask 31744   ;;  %v238_v0 = vmov 0.0   ;;  %vm239_vm2 = vmmov 0   ;;  %s299_s1 = inlined_call_operand.vmem [shape: f32[4,25], index: 1, kind: input, shape index: {}]   ;;  %s300_s0 = inlined_call_operand.vmem [shape: f32[8,4], index: 0, kind: input, shape index: {}]   ;;  %s301_s3 = inlined_call_operand.vmem [shape: f32[25,1], index: 3, kind: input, shape index: {}]   ;;  %s302_s2 = inlined_call_operand.vmem [shape: f32[1,25], index: 2, kind: input, shape index: {}]   ;;  %s303_s4 = inlined_call_operand.<no memory space> [shape: f32[1], index: 4, kind: input, shape index: {}]   ;;  %s304_s5 = inlined_call_operand.vmem [shape: f32[8,1], index: 5, kind: output, shape index: {}]  }
   0x1   :  { %211 = vmatprep.subr.mxu0 %v238_v0  ;;  %v22_v1 = vld [vmem:[%s299_s1] sm:$0xf]  ;;  %213 = vmatprep.mubr.msk.f32.mxu0 %vm239_vm2, %v238_v0  ;;  %v240_v4 = vmov 0.0|0.0   ;;  %v110_v5 = vld [vmem:[%s301_s3 + $0x8] sm:$0xff]  ;;  %v111_v7 = vld [vmem:[%s301_s3 + $0x10] sm:$0xff]  ;;  %vm119_vm3 = vcmask 1040384   ;;  %v114_v15 = vstv %s303_s4 }
   0x2   :  { %v21_v2 = vld [vmem:[%s300_s0] sm:$0xff]  ;;  %212 = vmatpush3.msk.msra.mxu0 %vm34_vm0, %v22_v1  ;;  %227 = vmatprep.subr.bf16.mxu1 %v240_v4  ;;  %v112_v8 = vld [vmem:[%s301_s3 + $0x18] sm:$0x1]  ;;  %vm241_vm4 = vmmov 1   ;;  %vm115_vm6 = vcmask 203776   ;;  %vm193_vm7 = vcmask 7168  }
   0x3   :  { %v109_v3 = vld [vmem:[%s301_s3] sm:$0xff]  ;;  %214 = vmatmul.mubr.msk.f32.vlgmr.msra.gmra.mrb[0].mxu0 %vm30_vm1, %v21_v2  ;;  %224 = vmatprep.mubr.msk.f32.mxu1 %vm239_vm2, %v238_v0  ;;  %v231_v9 = vpack.c.bf16 %v112_v8, %v111_v7  ;;  %vm232_vm5 = vmpackc.low %vm119_vm3, %vm241_vm4 }
   0x4   :  { %v228_v6 = vpack.c.bf16 %v110_v5, %v109_v3  ;;  %v199_v10 = vld [vmem:[%s302_s2] ss:$0 sm:$0xff] }
   0x6   :  { %229 = vmatpush3.bf16.msra.mxu1 %v228_v6 }
   0x7   :  { %230 = vmatprep.subr.bf16.mxu1 %v240_v4 }
   0xa   :  { %233 = vmatpush3.bf16.msk.msra.mxu1 %vm232_vm5, %v231_v9 }
  0xd6   :  { %v104_v11 = vpop.f32.mrb[0].mxu0 }
  0xd7   :  { %v105_v12 = vadd.f32 %v199_v10, %v104_v11  ;;  %v215_v13 = vpop.f32.mrb[1].mxu0 }
  0xd9   :  { %v108_v14 = vmax.f32 %v105_v12, 0.0 }
  0xdb   :  { %225 = vmatmul.mubr.msk.f32.vlgmr.msra.gmra.mrb[0].mxu1 %vm115_vm6, %v108_v14 }
 0x1ae   :  { %v189_v16 = vpop.f32.mrb[0].mxu1 }
 0x1af   :  { %v190_v17 = vadd.f32 %v189_v16, %v114_v15  ;;  %v226_v18 = vpop.f32.mrb[1].mxu1 }
 0x1b1   :  { %194 = vst.msk [vmem:[%s304_s5] sm:$0xff] %vm193_vm7, %v190_v17 }

</bundles_post_ra>
